<compile_context>
chip_gen: v7x
topology: tpu7x:2x2x1
jax: 0.10.0
libtpu: 0.0.40
codegen_flags: <defaults>
</compile_context>

<pallas_src>
import functools

import jax
import jax.numpy as jnp
from jax import lax
from jax.experimental import pallas as pl
from jax.experimental.pallas import tpu as pltpu


# --------------------------------------------------------------------------- #
# helpers
# --------------------------------------------------------------------------- #
def _round_up(x, m):
    return ((x + m - 1) // m) * m


def _fit_tile(extent_padded, unit, target):
    """Largest multiple of `unit` that divides `extent_padded` and is <= target."""
    n_units = extent_padded // unit
    t_units = max(1, min(max(target // unit, 1), n_units))
    while n_units % t_units:
        t_units -= 1
    return t_units * unit


def _chip_plan():
    """Per-generation tile targets + scoped-VMEM limit (conservative fallback)."""
    kind = ""
    try:
        kind = jax.devices()[0].device_kind.lower()
    except Exception:  # pragma: no cover - defensive
        pass
    # v5e / v6e: 128 MiB VMEM per TensorCore -> big tiles, raised limit.
    if ("v5 lite" in kind) or ("v5e" in kind) or ("v6" in kind):
        return dict(tm=512, tn=1024, tk=1024, vmem_limit=96 * 1024 * 1024)
    # v7x (64 MiB per TC) or unknown chip: conservative with headroom.
    return dict(tm=512, tn=512, tk=1024, vmem_limit=48 * 1024 * 1024)


def _dot_f32(a, b):
    # a: (m, k)  b: (k, n) -> (m, n), f32 accumulate on the MXU.
    return lax.dot_general(
        a, b, dimension_numbers=(((1,), (0,)), ((), ())),
        preferred_element_type=jnp.float32,
    )


# --------------------------------------------------------------------------- #
# kernels
# --------------------------------------------------------------------------- #
def _linear_kernel_single(x_ref, w_ref, b_ref, o_ref):
    # Whole K in one step: no scratch, bias fused into the single store.
    o_ref[...] = (_dot_f32(x_ref[...], w_ref[...]) + b_ref[...]).astype(o_ref.dtype)


def _linear_kernel_acc(x_ref, w_ref, b_ref, o_ref, acc_ref):
    # x tiled (tm, tk) over the K grid axis.
    k = pl.program_id(2)
    prod = _dot_f32(x_ref[...], w_ref[...])

    @pl.when(k == 0)
    def _():
        acc_ref[...] = prod            # direct write: no zero-init pass

    @pl.when(k > 0)
    def _():
        acc_ref[...] += prod

    @pl.when(k == pl.num_programs(2) - 1)
    def _():
        o_ref[...] = (acc_ref[...] + b_ref[...]).astype(o_ref.dtype)


def _linear_kernel_acc_xres(x_ref, w_ref, b_ref, o_ref, acc_ref, *, tk):
    # x resident in VMEM per M-block: block (tm, K_pad), constant over j/k.
    k = pl.program_id(2)
    kk = pl.multiple_of(k * tk, 128)
    prod = _dot_f32(x_ref[:, pl.ds(kk, tk)], w_ref[...])

    @pl.when(k == 0)
    def _():
        acc_ref[...] = prod

    @pl.when(k > 0)
    def _():
        acc_ref[...] += prod

    @pl.when(k == pl.num_programs(2) - 1)
    def _():
        o_ref[...] = (acc_ref[...] + b_ref[...]).astype(o_ref.dtype)


# --------------------------------------------------------------------------- #
# module wrapper (one-time param prep at init, per-call x padding only)
# --------------------------------------------------------------------------- #
class LinModelPallas:
    """Pallas-TPU equivalent of LinModel.forward:  y = x @ W.T + b."""

    def __init__(self, weight, bias, *, tm_target=None, tn_target=None,
                 tk_target=None, use_bf16=False):
        N, K = weight.shape
        assert bias.shape == (N,)
        plan = _chip_plan()
        self.tm_target = tm_target or plan["tm"]
        tn_t = tn_target or plan["tn"]
        tk_t = tk_target or plan["tk"]
        self.vmem_limit = plan["vmem_limit"]
        self.x_resident_max_bytes = 4 * 1024 * 1024

        self.K, self.N = K, N
        self.K_pad = _round_up(K, 128)
        self.N_pad = _round_up(N, 128)
        self.tk = _fit_tile(self.K_pad, 128, tk_t)
        self.tn = _fit_tile(self.N_pad, 128, tn_t)

        # One-time parameter prep (NOT per call): transpose PyTorch (out, in)
        # weight to (in, out) so the kernel needs no transpose, then pad.
        self.x_dtype = jnp.bfloat16 if use_bf16 else jnp.float32
        w_t = jnp.asarray(weight, jnp.float32).T.astype(self.x_dtype)   # (K, N)
        self.w = jnp.zeros((self.K_pad, self.N_pad), self.x_dtype).at[:K, :N].set(w_t)
        self.b = jnp.zeros((1, self.N_pad), jnp.float32).at[0, :N].set(
            jnp.asarray(bias, jnp.float32))

    def __call__(self, x):
        B, K = x.shape
        assert K == self.K
        K_pad, N_pad = self.K_pad, self.N_pad
        tk, tn = self.tk, self.tn

        M_pad = _round_up(B, 8)
        tm = _fit_tile(M_pad, 8, self.tm_target)

        # Keep >=2 blocks on a parallel axis when possible (v7x megacore).
        if (M_pad // tm == 1) and (N_pad // tn == 1) and (N_pad // 128 >= 2):
            tn = _fit_tile(N_pad, 128, max(128, tn // 2))

        # Pad/cast x per call (activation; weight/bias were prepared at init).
        if (M_pad, K_pad) != (B, K) or x.dtype != self.x_dtype:
            x_p = jnp.zeros((M_pad, K_pad), self.x_dtype).at[:B, :K].set(
                x.astype(self.x_dtype))
        else:
            x_p = x

        grid_m, grid_n, grid_k = M_pad // tm, N_pad // tn, K_pad // tk

        cost = pl.CostEstimate(
            flops=2 * M_pad * N_pad * K_pad,
            transcendentals=0,
            bytes_accessed=int(x_p.size * x_p.dtype.itemsize
                               + self.w.size * self.w.dtype.itemsize
                               + self.b.size * 4
                               + M_pad * N_pad * 4),
        )

        if grid_k == 1:
            out = pl.pallas_call(
                _linear_kernel_single,
                out_shape=jax.ShapeDtypeStruct((M_pad, N_pad), jnp.float32),
                grid_spec=pltpu.PrefetchScalarGridSpec(
                    num_scalar_prefetch=0,
                    grid=(grid_m, grid_n),
                    in_specs=[
                        pl.BlockSpec((tm, K_pad), lambda i, j: (i, 0)),   # x
                        pl.BlockSpec((K_pad, tn), lambda i, j: (0, j)),   # W^T
                        pl.BlockSpec((1, tn), lambda i, j: (0, j)),       # bias
                    ],
                    out_specs=pl.BlockSpec((tm, tn), lambda i, j: (i, j)),
                ),
                compiler_params=pltpu.CompilerParams(
                    dimension_semantics=("parallel", "parallel"),
                    vmem_limit_bytes=self.vmem_limit,
                ),
                cost_estimate=cost,
            )(x_p, self.w, self.b)
        else:
            x_bytes = M_pad * K_pad * x_p.dtype.itemsize
            if x_bytes <= self.x_resident_max_bytes:
                kernel = functools.partial(_linear_kernel_acc_xres, tk=tk)
                # x block constant over (j, k): fetched once per M-block.
                x_spec = pl.BlockSpec((tm, K_pad), lambda i, j, k: (i, 0))
            else:
                kernel = _linear_kernel_acc
                x_spec = pl.BlockSpec((tm, tk), lambda i, j, k: (i, k))

            out = pl.pallas_call(
                kernel,
                out_shape=jax.ShapeDtypeStruct((M_pad, N_pad), jnp.float32),
                grid_spec=pltpu.PrefetchScalarGridSpec(
                    num_scalar_prefetch=0,
                    grid=(grid_m, grid_n, grid_k),
                    in_specs=[
                        x_spec,                                            # x
                        pl.BlockSpec((tk, tn), lambda i, j, k: (k, j)),    # W^T
                        pl.BlockSpec((1, tn), lambda i, j, k: (0, j)),     # bias
                    ],
                    out_specs=pl.BlockSpec((tm, tn), lambda i, j, k: (i, j)),
                    scratch_shapes=[pltpu.VMEM((tm, tn), jnp.float32)],
                ),
                compiler_params=pltpu.CompilerParams(
                    dimension_semantics=("parallel", "parallel", "arbitrary"),
                    vmem_limit_bytes=self.vmem_limit,
                ),
                cost_estimate=cost,
            )(x_p, self.w, self.b)

        if (M_pad, N_pad) != (B, self.N):
            out = out[:B, :self.N]
        return out


# --------------------------------------------------------------------------- #
# self-test
# --------------------------------------------------------------------------- #
if __name__ == "__main__":
    key = jax.random.PRNGKey(0)

    def make_params(k, in_size, out_size):
        kw, kb = jax.random.split(k)
        bound = 1.0 / (in_size ** 0.5)
        w = jax.random.uniform(kw, (out_size, in_size), jnp.float32, -bound, bound)
        b = jax.random.uniform(kb, (out_size,), jnp.float32, -bound, bound)
        return w, b

    # --- test 1: demo shapes (single-K fast path) --------------------------- #
    B, in_size, out_size = 8, 32, 16
    k1, k2, key = jax.random.split(key, 3)
    x = jax.random.normal(k1, (B, in_size), jnp.float32)
    w, b = make_params(k2, in_size, out_size)

    model = LinModelPallas(w, b)
    out = jax.block_until_ready(model(x))
    ref = jnp.dot(x, w.T, precision=lax.Precision.HIGHEST) + b
    assert out.shape == (B, out_size)
    assert jnp.allclose(out, ref, atol=1e-3, rtol=1e-3)

    # --- test 2: multi-K-step accumulator path, x resident in VMEM ---------- #
    B2, in2, out2 = 16, 384, 256
    k1, k2, key = jax.random.split(key, 3)
    x2 = jax.random.normal(k1, (B2, in2), jnp.float32)
    w2, b2 = make_params(k2, in2, out2)
    model2 = LinModelPallas(w2, b2, tm_target=8, tn_target=128, tk_target=128)
    out2_ = jax.block_until_ready(model2(x2))
    ref2 = jnp.dot(x2, w2.T, precision=lax.Precision.HIGHEST) + b2
    assert jnp.allclose(out2_, ref2, atol=1e-3, rtol=1e-3)

    # --- test 3: multi-K-step path with x tiled over K (non-resident) ------- #
    model3 = LinModelPallas(w2, b2, tm_target=8, tn_target=128, tk_target=128)
    model3.x_resident_max_bytes = 0   # force the (tm, tk) x-tiling kernel
    out3_ = jax.block_until_ready(model3(x2))
    assert jnp.allclose(out3_, ref2, atol=1e-3, rtol=1e-3)

    print("KERNEL_OK")
</pallas_src>

<mosaic_0001>
module attributes {stable_mosaic.version = 11 : i64} {
  func.func @_linear_kernel_single(%arg0: i32, %arg1: i32, %arg2: memref<8x128xf32, #tpu.memory_space<vmem>>, %arg3: memref<128x128xf32, #tpu.memory_space<vmem>>, %arg4: memref<1x128xf32, #tpu.memory_space<vmem>>, %arg5: memref<8x128xf32, #tpu.memory_space<vmem>>) attributes {dimension_semantics = [#tpu.dimension_semantics<parallel>, #tpu.dimension_semantics<parallel>], iteration_bounds = array<i64: 1, 1>, scalar_prefetch = 0 : i64, scratch_operands = 0 : i64, tpu.core_type = #tpu.core_type<tc>, window_params = [{transform_indices = @transform_0, window_bounds = array<i64: 8, 128>}, {transform_indices = @transform_1, window_bounds = array<i64: 128, 128>}, {transform_indices = @transform_2, window_bounds = array<i64: 1, 128>}, {transform_indices = @transform_3, window_bounds = array<i64: 8, 128>}]} {
    %c0 = arith.constant 0 : index
    %c0_0 = arith.constant 0 : index
    %0 = vector.load %arg2[%c0, %c0_0] : memref<8x128xf32, #tpu.memory_space<vmem>>, vector<8x128xf32>
    %c0_1 = arith.constant 0 : index
    %c0_2 = arith.constant 0 : index
    %1 = vector.load %arg3[%c0_1, %c0_2] : memref<128x128xf32, #tpu.memory_space<vmem>>, vector<128x128xf32>
    %cst = arith.constant dense<0.000000e+00> : vector<8x128xf32>
    %2 = tpu.matmul %0, %1, %cst {dimension_numbers = #tpu.dot_dimension_numbers<[1], [0], [0], [1], [0, 0, 1, 1], [], []>} : vector<8x128xf32>, vector<128x128xf32>, vector<8x128xf32> -> vector<8x128xf32>
    %c0_3 = arith.constant 0 : index
    %c0_4 = arith.constant 0 : index
    %3 = vector.load %arg4[%c0_3, %c0_4] : memref<1x128xf32, #tpu.memory_space<vmem>>, vector<1x128xf32>
    %4 = vector.broadcast %3 : vector<1x128xf32> to vector<8x128xf32>
    %5 = arith.addf %2, %4 : vector<8x128xf32>
    %c0_5 = arith.constant 0 : index
    %c0_6 = arith.constant 0 : index
    %6 = vector.load %arg5[%c0_5, %c0_6] : memref<8x128xf32, #tpu.memory_space<vmem>>, vector<8x128xf32>
    tpu.vector_store %arg5[%c0_5, %c0_6], %5 {strides = array<i32>} : memref<8x128xf32, #tpu.memory_space<vmem>>, vector<8x128xf32>,
    return
  }
  func.func @transform_0(%arg0: i32, %arg1: i32) -> (i32, i32) {
    %c0_i32 = arith.constant 0 : i32
    %c0_i32_0 = arith.constant 0 : i32
    return %arg0, %c0_i32 : i32, i32
  }
  func.func @transform_1(%arg0: i32, %arg1: i32) -> (i32, i32) {
    %c0_i32 = arith.constant 0 : i32
    %c0_i32_0 = arith.constant 0 : i32
    return %c0_i32, %arg1 : i32, i32
  }
  func.func @transform_2(%arg0: i32, %arg1: i32) -> (i32, i32) {
    %c0_i32 = arith.constant 0 : i32
    %c0_i32_0 = arith.constant 0 : i32
    return %c0_i32, %arg1 : i32, i32
  }
  func.func @transform_3(%arg0: i32, %arg1: i32) -> (i32, i32) {
    %c0_i32 = arith.constant 0 : i32
    return %arg0, %arg1 : i32, i32
  }
}

</mosaic_0001>

<bundles_post_ra>
// kernel: tpu_custom_call.1
= control target key start
LH: loop header
LB: loop body
LE: loop exit
PB: predicated region body
PF: predicated region fallthrough
CT: control target
= control target key end

     0   :  { %8 = vsyncpa [#allocation3], 0  ;;  %s383_s0 = inlined_call_operand.hbm [shape: f32[8,128], index: 0, kind: input, shape index: {}]   ;;  %s384_s1 = inlined_call_operand.hbm [shape: f32[128,128], index: 1, kind: input, shape index: {}]   ;;  %s385_s2 = inlined_call_operand.vmem [shape: f32[1,128], index: 2, kind: input, shape index: {}]   ;;  %s386_s3 = inlined_call_operand.hbm [shape: f32[8,128], index: 3, kind: output, shape index: {}]  }
   0x1   :  { %9 = vsyncpa [#allocation6], 0 }
   0x2   :  { %10 = vsyncpa [#allocation4], 0  ;;  %s309_s12 = smov [#allocation2]   ;;  %s310_s14 = smov [#allocation5]  }
   0x3   :  { %s17_s13 = sshll.u32 %s309_s12, 4  ;;  %s26_s15 = sshll.u32 %s310_s14, 4  ;;  %s18_s13 = int_to_ptr.vmem [resolvable:$true] %s17_s13  ;;  %s337_s15 = int_to_ptr.vmem [resolvable:$true] %s26_s15 }
   0x4   :  { %s237_s18 = scalar_lea.hbm %s383_s0, 128 }
   0x5   :  { %p238_p0 = scmp.ne.s32.totalorder %s383_s0, %s237_s18  ;;  %p241_p1 = scmp.lt.u32.totalorder %s237_s18, %s383_s0 }
   0x7   :  { %p243_p2 = pnand %p241_p1, %p238_p0 }
   0x9   :  { %246 = shalt.err (!%p243_p2)
}
   0xa   :  { %s247_s23 = scalar_lea.vmem %s18_s13, 128  ;;  %p252_p4 = scmp.lt.s32.totalorder %s18_s13, %s18_s13 }
   0xb   :  { %p248_p3 = scmp.ne.s32.totalorder %s18_s13, %s247_s23  ;;  %p253_p5 = scmp.lt.s32.totalorder %s247_s23, %s247_s23 }
   0xd   :  { %p254_p6 = por %p253_p5, %p252_p4 }
   0xf   :  { %p255_p7 = pnand %p254_p6, %p248_p3 }
  0x11   :  { %258 = shalt.err (!%p255_p7)
}
  0x12   :  { %20 = dma.hbm_to_vmem [thread:$0]  %s383_s0, 128, %s18_s13, [#allocation3]  }
  0x13   :  { %s259_s28 = scalar_lea.hbm %s384_s1, 2048 }
  0x14   :  { %p260_p8 = scmp.ne.s32.totalorder %s384_s1, %s259_s28  ;;  %p263_p9 = scmp.lt.u32.totalorder %s259_s28, %s384_s1 }
  0x16   :  { %p265_p10 = pnand %p263_p9, %p260_p8 }
  0x18   :  { %268 = shalt.err (!%p265_p10)
}
  0x19   :  { %s269_s6 = scalar_lea.vmem %s337_s15, 2048  ;;  %p274_p12 = scmp.lt.s32.totalorder %s337_s15, %s337_s15 }
  0x1a   :  { %p270_p11 = scmp.ne.s32.totalorder %s337_s15, %s269_s6  ;;  %p275_p13 = scmp.lt.s32.totalorder %s269_s6, %s269_s6 }
  0x1c   :  { %p276_p0 = por %p275_p13, %p274_p12 }
  0x1e   :  { %p277_p1 = pnand %p276_p0, %p270_p11 }
  0x20   :  { %280 = shalt.err (!%p277_p1)
}
  0x21   :  { %s311_s0 = smov 128   ;;  %s312_s7 = smov 8  }
  0x22   :  { %32 = dma.hbm_to_vmem [thread:$0]  %s384_s1, 2048, %s337_s15, [#allocation6], %s311_s0, %s311_s0, %s312_s7  }
  0x23   :  { %303 = dma.done.wait [#allocation3], 128  }
  0x24   :  { %304 = vsyncadd [#allocation3], 4294967168 }
  0x25   :  { %305 = dma.done.wait [#allocation6], 2048  }
  0x26   :  { %306 = vsyncadd [#allocation6], 4294965248  ;;  %v313_v0 = vmov 0.0|0.0   ;;  %vm314_vm0 = vmmov 0   ;;  %v315_v1 = vmov 0.0   ;;  %v42_v2 = vld [vmem:[#allocation5] sm:$0xff] }
  0x27   :  { %205 = vmatprep.subr.bf16.mxu0 %v313_v0  ;;  %202 = vmatprep.mubr.msk.f32.mxu0 %vm314_vm0, %v315_v1  ;;  %v43_v3 = vld [vmem:[#allocation5 + $0x8] sm:$0xff]  ;;  %v44_v4 = vld [vmem:[#allocation5 + $0x10] sm:$0xff]  ;;  %v45_v6 = vld [vmem:[#allocation5 + $0x18] sm:$0xff]  ;;  %s316_s11 = smov [#allocation7]  }
  0x28   :  { %v206_v5 = vpack.c.bf16 %v43_v3, %v42_v2  ;;  %v209_v7 = vpack.c.bf16 %v45_v6, %v44_v4  ;;  %v46_v8 = vld [vmem:[#allocation5 + $0x20] sm:$0xff]  ;;  %v47_v9 = vld [vmem:[#allocation5 + $0x28] sm:$0xff]  ;;  %v48_v11 = vld [vmem:[#allocation5 + $0x30] sm:$0xff]  ;;  %s142_s12 = sshll.u32 %s316_s11, 4  ;;  %s143_s12 = int_to_ptr.vmem [resolvable:$true] %s142_s12 }
  0x29   :  { %v212_v10 = vpack.c.bf16 %v47_v9, %v46_v8  ;;  %v49_v12 = vld [vmem:[#allocation5 + $0x38] sm:$0xff]  ;;  %v50_v14 = vld [vmem:[#allocation5 + $0x40] sm:$0xff]  ;;  %v51_v15 = vld [vmem:[#allocation5 + $0x48] sm:$0xff]  ;;  %s281_s13 = scalar_lea.vmem %s143_s12, 128  ;;  %p286_p3 = scmp.lt.s32.totalorder %s143_s12, %s143_s12 }
  0x2a   :  { %207 = vmatpush3.bf16.msra.mxu0 %v206_v5  ;;  %v215_v13 = vpack.c.bf16 %v49_v12, %v48_v11  ;;  %v218_v16 = vpack.c.bf16 %v51_v15, %v50_v14  ;;  %v52_v17 = vld [vmem:[#allocation5 + $0x50] sm:$0xff]  ;;  %v53_v18 = vld [vmem:[#allocation5 + $0x58] sm:$0xff]  ;;  %v54_v20 = vld [vmem:[#allocation5 + $0x60] sm:$0xff]  ;;  %p282_p2 = scmp.ne.s32.totalorder %s143_s12, %s281_s13  ;;  %p287_p4 = scmp.lt.s32.totalorder %s281_s13, %s281_s13 }
  0x2b   :  { %208 = vmatprep.subr.bf16.mxu0 %v313_v0  ;;  %v221_v19 = vpack.c.bf16 %v53_v18, %v52_v17  ;;  %v55_v21 = vld [vmem:[#allocation5 + $0x68] sm:$0xff]  ;;  %v56_v23 = vld [vmem:[#allocation5 + $0x70] sm:$0xff]  ;;  %v57_v24 = vld [vmem:[#allocation5 + $0x78] sm:$0xff] }
  0x2c   :  { %v224_v22 = vpack.c.bf16 %v55_v21, %v54_v20  ;;  %v227_v25 = vpack.c.bf16 %v57_v24, %v56_v23  ;;  %v41_v26 = vld [vmem:[#allocation2] sm:$0xff]  ;;  %p288_p5 = por %p287_p4, %p286_p3 }
  0x2d   :  { %v152_v27 = vld [vmem:[%s385_s2] ss:$0 sm:$0xff] }
  0x2e   :  { %210 = vmatpush3.bf16.msra.mxu0 %v209_v7  ;;  %p289_p6 = pnand %p288_p5, %p282_p2 }
  0x2f   :  { %211 = vmatprep.subr.bf16.mxu0 %v313_v0 }
  0x32   :  { %213 = vmatpush3.bf16.msra.mxu0 %v212_v10 }
  0x33   :  { %214 = vmatprep.subr.bf16.mxu0 %v313_v0 }
  0x36   :  { %216 = vmatpush3.bf16.msra.mxu0 %v215_v13 }
  0x37   :  { %217 = vmatprep.subr.bf16.mxu0 %v313_v0 }
  0x3a   :  { %219 = vmatpush3.bf16.msra.mxu0 %v218_v16 }
  0x3b   :  { %220 = vmatprep.subr.bf16.mxu0 %v313_v0 }
  0x3e   :  { %222 = vmatpush3.bf16.msra.mxu0 %v221_v19 }
  0x3f   :  { %223 = vmatprep.subr.bf16.mxu0 %v313_v0 }
  0x42   :  { %225 = vmatpush3.bf16.msra.mxu0 %v224_v22 }
  0x43   :  { %226 = vmatprep.subr.bf16.mxu0 %v313_v0 }
  0x46   :  { %228 = vmatpush3.bf16.msra.mxu0 %v227_v25 }
  0x49   :  { %203 = vmatmul.mubr.f32.vlgmr.msra.gmra.mrb[0].mxu0 %v41_v26 }
 0x11c   :  { %v131_v28 = vpop.f32.mrb[0].mxu0 }
 0x11d   :  { %v132_v29 = vadd.f32 %v152_v27, %v131_v28  ;;  %v204_v30 = vpop.f32.mrb[1].mxu0 }
 0x11f   :  { %135 = vst [vmem:[#allocation7] sm:$0xff] %v132_v29 }
 0x120   :  { %292 = shalt.err (!%p289_p6)
}
 0x121   :  { %s293_s16 = scalar_lea.hbm %s386_s3, 128 }
 0x122   :  { %p294_p7 = scmp.ne.s32.totalorder %s386_s3, %s293_s16  ;;  %p297_p8 = scmp.lt.u32.totalorder %s293_s16, %s386_s3 }
 0x124   :  { %p299_p9 = pnand %p297_p8, %p294_p7 }
 0x126   :  { %302 = shalt.err (!%p299_p9)
}
 0x127   :  { %145 = dma.vmem_to_hbm [thread:$0]  %s143_s12, 128, %s386_s3, [#allocation4]  }
 0x128   :  { %307 = dma.done.wait [#allocation4], 128  }
 0x129   :  { %308 = vsyncadd [#allocation4], 4294967168 }
 0x12a   :  { %149 = vsyncpa [#allocation3], 1 }
 0x12b   :  { %150 = vsyncpa [#allocation6], 1 }
 0x12c   :  { %151 = vsyncpa [#allocation4], 1 }

</bundles_post_ra>
